<compile_context>
chip_gen: v7x
topology: tpu7x:2x2x1
jax: 0.10.0
libtpu: 0.0.40
codegen_flags: <defaults>
</compile_context>

<pallas_src>
import functools

import numpy as np
import jax
import jax.numpy as jnp
from jax import lax
from jax.experimental import pallas as pl
from jax.experimental.pallas import tpu as pltpu

# ----------------------------- configuration -------------------------------
BS = 2              # batch size
N_AGENTS = 4
INPUT_SHAPE = 32    # per-agent observation dim
RNN_HIDDEN = 32     # args.rnn_hidden_dim
N_ACTIONS = 8
LATENT_DIM = 4
TINY_MSG = 8        # args.tiny_msg_size
NN_HIDDEN = 32      # args.nn_hidden_size
ATTN_DIM = 16       # args.attention_dim
BN_EPS = 1e-5
LRELU_SLOPE = 0.01  # nn.LeakyReLU() default

H, A, L, AD, NN, NA = RNN_HIDDEN, N_ACTIONS, LATENT_DIM, ATTN_DIM, NN_HIDDEN, N_AGENTS
NL = NA * L         # n_agents * latent_dim (mean-half width of the Gaussian params)

GROUP = 128         # every slab group is padded to a 128-lane boundary

# ---- heads group column layout (within its 128-wide group) -----------------
HD_QORIG = 0                      # fc2(h)
HD_HID = A                        # [inference hidden | demand hidden], contiguous 2*NN
HD_Q = A + 2 * NN                 # w_query(h)   (1/sqrt(AD) folded)
HD_GQ = HD_Q + AD                 # tar_query(h) (1/sqrt(AD) folded)
HEADS_USED = HD_GQ + AD           # 104

# ---- WP slab (64 rows) group offsets, all multiples of 128 ------------------
WP_W2 = 0                         # blockdiag(wi2_mean, wd2_mean)
WP_P1 = GROUP                     # pairwise first layers + w_key/tar_key
WP_P2 = 2 * GROUP                 # blockdiag(wm2, wg2)
WP_COLS = 3 * GROUP
P1_HID = 0
P1_KEY = 2 * NN                   # 64
P1_GKEY = P1_KEY + AD             # 80
P1_USED = P1_GKEY + AD            # 96

# ---- bias slab group offsets -------------------------------------------------
BG_GRU = 0
BG_HEADS = GROUP
BG_MEANS = 2 * GROUP
BG_P1 = 3 * GROUP
BG_P2 = 4 * GROUP
BIAS_COLS = 5 * GROUP

OUT_W = 128                       # padded output: [return_q | return_g_q | h | pad]

_VSPEC = pl.BlockSpec(memory_space=pltpu.MemorySpace.VMEM)


def _dot(a, b):
    return jnp.dot(a, b, preferred_element_type=jnp.float32)


def _leaky_relu(x):
    return jnp.where(x >= 0, x, LRELU_SLOPE * x)


# ------------------------------ fused kernel --------------------------------
def _maic_kernel(bs, xh_ref, wg_ref, wh_ref, wp_ref, b_ref, cm_ref, cn_ref, out_ref):
    f32 = jnp.float32
    bf16 = jnp.bfloat16
    n_rows = bs * NA                 # per-agent rows
    m_rows = n_rows * NA             # pairwise rows, r = (b*nA + i)*nA + j

    # constant-slab column offsets (static)
    cm_keep = 0
    cm_s = H + 2 * NL
    cm_ysel = cm_s + n_rows
    cm_oh = cm_ysel + NA
    cn_m0 = 0
    cn_diag = m_rows

    xh = xh_ref[...]                              # (n, input+H) f32 = [x | h_in]
    h_in = xh[:, INPUT_SHAPE:INPUT_SHAPE + H]

    # ---- input_qkv(v-chunk) + GRUCell folded into ONE matmul.
    #      columns of WG: [r_sum | z_sum | gi_n | gh_n]
    g = _dot(xh.astype(bf16), wg_ref[...]) + b_ref[:, BG_GRU:BG_GRU + 4 * H]
    r = jax.nn.sigmoid(g[:, 0:H])
    z = jax.nn.sigmoid(g[:, H:2 * H])
    cand = jnp.tanh(g[:, 2 * H:3 * H] + r * g[:, 3 * H:4 * H])
    h = (1.0 - z) * cand + z * h_in

    # ---- every head that consumes h, as a single matmul.
    h_b = h.astype(bf16)
    heads = _dot(h_b, wh_ref[...]) + b_ref[:, BG_HEADS:BG_HEADS + GROUP]
    q_origin = heads[:, HD_QORIG:HD_QORIG + A]
    hid2 = _leaky_relu(heads[:, HD_HID:HD_HID + 2 * NN])   # [inference hid | demand hid]
    query = heads[:, HD_Q:HD_Q + AD]
    g_query = heads[:, HD_GQ:HD_GQ + AD]

    # ---- mean halves of inference_net / demand_net outputs (test_mode latents).
    means = _dot(hid2.astype(bf16), wp_ref[:, WP_W2:WP_W2 + 2 * NL]) \
        + b_ref[:, BG_MEANS:BG_MEANS + 2 * NL]             # (n, 2*NL)

    # ---- pairwise expansion: row-repeat via precomputed 0/1 matmul + keep mask.
    y = jnp.concatenate([h, means], axis=-1)               # (n, H + 2*NL)
    S = cm_ref[:, cm_s:cm_s + n_rows]                      # (m, n)
    keep = cm_ref[:, cm_keep:cm_keep + H + 2 * NL]         # (m, H + 2*NL)
    x_pair = _dot(S, y) * keep

    # msg_net / g_value_net hidden layers + w_key / tar_key in one matmul
    p1 = _dot(x_pair.astype(bf16), wp_ref[:, WP_P1:WP_P1 + P1_USED]) \
        + b_ref[:, BG_P1:BG_P1 + P1_USED]
    hid = _leaky_relu(p1[:, P1_HID:P1_HID + 2 * NN])
    key = p1[:, P1_KEY:P1_KEY + AD]                        # w_key(latent_i) at pair (b,i,j)
    g_key = p1[:, P1_GKEY:P1_GKEY + AD]                    # tar_key(latent) at pair (b,i,j)
    mv = _dot(hid.astype(bf16), wp_ref[:, WP_P2:WP_P2 + 2 * A]) \
        + b_ref[:, BG_P2:BG_P2 + 2 * A]
    msg = mv[:, 0:A]
    g_val = mv[:, A:2 * A]

    # ---- attention: alpha[b, jr, i] = query(h_jr) . w_key(latent agent i inferred about jr)
    dn = (((1,), (1,)), ((), ()))
    qk = lax.dot_general(query, key, dn, preferred_element_type=f32)    # (n, m)
    gqk = lax.dot_general(g_query, g_key, dn, preferred_element_type=f32)

    m0 = cn_ref[:, cn_m0:cn_m0 + m_rows]                   # (n, m) receiver/about mask
    diag = cn_ref[:, cn_diag:cn_diag + NA]                 # (n, NA) self mask
    y_sel = cm_ref[:, cm_ysel:cm_ysel + NA]                # (m, NA) sender one-hot

    logits = _dot(qk * m0, y_sel)                          # (n, NA)
    g_logits = _dot(gqk * m0, y_sel)
    logits = jnp.where(diag > 0.5, -1e9, logits)           # alpha[:, i, i] = -1e9
    g_logits = jnp.where(diag > 0.5, -1e9, g_logits)

    def softmax_last(zz):
        mx = jnp.max(zz, axis=-1, keepdims=True)
        e = jnp.exp(zz - mx)
        return e * pl.reciprocal(jnp.sum(e, axis=-1, keepdims=True), approx=True)

    alpha = softmax_last(logits)
    tar_alpha = softmax_last(g_logits)
    # test-mode gating threshold (alpha only, no renormalization — as in torch)
    alpha = jnp.where(alpha < (0.3 / NA), 0.0, alpha)

    # ---- flatten alpha/tar_alpha into pair-row order, weight msgs, scatter to receivers
    onehot_j = cm_ref[:, cm_oh:cm_oh + NA]                 # (m, NA)
    ea = _dot(S, jnp.concatenate([alpha, tar_alpha], axis=-1))          # (m, 2*NA)
    a_flat = jnp.sum(ea[:, 0:NA] * onehot_j, axis=-1, keepdims=True)    # (m, 1)
    ta_flat = jnp.sum(ea[:, NA:2 * NA] * onehot_j, axis=-1, keepdims=True)
    gated = jnp.concatenate([a_flat * msg, ta_flat * g_val], axis=-1)   # (m, 2*A)
    delta = _dot(m0, gated)                                             # (n, 2*A)

    return_q = q_origin + delta[:, 0:A]
    return_g_q = q_origin + delta[:, A:2 * A]
    pad = jnp.zeros((n_rows, OUT_W - (2 * A + H)), f32)
    out_ref[...] = jnp.concatenate([return_q, return_g_q, h, pad], axis=-1)


# ---------------------------- raw parameter init -----------------------------
def init_params(seed=0):
    key = jax.random.PRNGKey(seed)
    ks = iter(jax.random.split(key, 64))

    def lin(fan_in, fan_out):
        bound = 1.0 / (fan_in ** 0.5)   # PyTorch default Linear / GRUCell init range
        w = jax.random.uniform(next(ks), (fan_in, fan_out), jnp.float32, -bound, bound)
        b = jax.random.uniform(next(ks), (1, fan_out), jnp.float32, -bound, bound)
        return w, b

    p = {}
    # input_qkv = Linear(input, 3H); only the v chunk reaches any output
    # (softmax over a size-1 dim == 1), so only that chunk is materialized.
    p['wv'], p['bv'] = lin(INPUT_SHAPE, H)
    for g in ('r', 'z', 'n'):                         # GRUCell gates
        p[f'wi{g}'], p[f'bi{g}'] = lin(H, H)
        p[f'wh{g}'], p[f'bh{g}'] = lin(H, H)
    p['wfc2'], p['bfc2'] = lin(H, A)
    p['wt'], p['bt'] = lin(H, TINY_MSG)               # tiny_msg_net
    p['wi1'], p['bi1'] = lin(TINY_MSG, NN)            # inference_net
    p['wi2'], p['bi2'] = lin(NN, 2 * NL)
    p['wd1'], p['bd1'] = lin(H, NN)                   # demand_net
    p['wd2'], p['bd2'] = lin(NN, 2 * NL)
    p['wm1'], p['bm1'] = lin(H + L, NN)               # msg_net (rows: [h | latent])
    p['wm2'], p['bm2'] = lin(NN, A)
    p['wg1'], p['bg1'] = lin(H + L, NN)               # g_value_net
    p['wg2'], p['bg2'] = lin(NN, A)
    p['wq'], p['bq'] = lin(H, AD)                     # w_query
    p['wkk'], p['bkk'] = lin(L, AD)                   # w_key
    p['wtq'], p['btq'] = lin(H, AD)                   # tar_query
    p['wtk'], p['btk'] = lin(L, AD)                   # tar_key
    return p


# ----------------------- fold + concatenate into slabs -----------------------
def pack_params(p):
    """Fold BN / scaling / tiny_msg_net / input_qkv and build 128-aligned slabs."""
    f32 = jnp.float32
    # eval-mode BatchNorm1d with default stats: y = x * s (gamma=1, beta=0, rm=0, rv=1)
    s = 1.0 / jnp.sqrt(1.0 + BN_EPS)
    wi1_f, bi1_f = p['wi1'] * s, p['bi1'] * s
    wd1_f, bd1_f = p['wd1'] * s, p['bd1'] * s
    # fold tiny_msg_net (Linear, no nonlinearity after) into inference_net's first Linear
    w_hi = p['wt'] @ wi1_f
    b_hi = p['bt'] @ wi1_f + bi1_f
    # fold the 1/sqrt(attention_dim) query scaling
    sc = 1.0 / (AD ** 0.5)
    wq_s, bq_s = p['wq'] * sc, p['bq'] * sc
    wtq_s, btq_s = p['wtq'] * sc, p['btq'] * sc

    def zz(r, c):
        return jnp.zeros((r, c), f32)

    # --- fused input_qkv(v) + GRU gate slab; activation = [x | h_in]
    top = jnp.concatenate([p['wv'] @ p['wir'], p['wv'] @ p['wiz'],
                           p['wv'] @ p['win'], zz(INPUT_SHAPE, H)], axis=1)
    bot = jnp.concatenate([p['whr'], p['whz'], zz(H, H), p['whn']], axis=1)
    WG = jnp.concatenate([top, bot], axis=0)                       # (input+H, 4H)
    bg = jnp.concatenate([p['bv'] @ p['wir'] + p['bir'] + p['bhr'],
                          p['bv'] @ p['wiz'] + p['biz'] + p['bhz'],
                          p['bv'] @ p['win'] + p['bin'],
                          p['bhn']], axis=1)                       # (1, 4H)

    # --- heads slab (H, 128)
    WH = jnp.concatenate([p['wfc2'], w_hi, wd1_f, wq_s, wtq_s,
                          zz(H, GROUP - HEADS_USED)], axis=1)
    b_heads = jnp.concatenate([p['bfc2'], b_hi, bd1_f, bq_s, btq_s,
                               zz(1, GROUP - HEADS_USED)], axis=1)

    # --- WP group 0: blockdiag(wi2_mean, wd2_mean) — only mean halves in test_mode
    wi2m, bi2m = p['wi2'][:, :NL], p['bi2'][:, :NL]
    wd2m, bd2m = p['wd2'][:, :NL], p['bd2'][:, :NL]
    g0 = jnp.zeros((2 * NN, GROUP), f32)
    g0 = g0.at[0:NN, 0:NL].set(wi2m)
    g0 = g0.at[NN:2 * NN, NL:2 * NL].set(wd2m)
    b2 = jnp.concatenate([bi2m, bd2m, zz(1, GROUP - 2 * NL)], axis=1)

    # --- WP group 1: pairwise first layers + keys; rows = [h | infer means | demand means]
    wm1_h, wm1_l = p['wm1'][:H], p['wm1'][H:]
    wg1_h, wg1_l = p['wg1'][:H], p['wg1'][H:]
    g1 = jnp.zeros((H + 2 * NL, GROUP), f32)
    g1 = g1.at[0:H, 0:NN].set(wm1_h)
    g1 = g1.at[0:H, NN:2 * NN].set(wg1_h)
    g1 = g1.at[H:H + NL, 0:NN].set(jnp.tile(wm1_l, (NA, 1)))
    g1 = g1.at[H:H + NL, P1_KEY:P1_KEY + AD].set(jnp.tile(p['wkk'], (NA, 1)))
    g1 = g1.at[H + NL:H + 2 * NL, NN:2 * NN].set(jnp.tile(wg1_l, (NA, 1)))
    g1 = g1.at[H + NL:H + 2 * NL, P1_GKEY:P1_GKEY + AD].set(jnp.tile(p['wtk'], (NA, 1)))
    bp1 = jnp.concatenate([p['bm1'], p['bg1'], p['bkk'], p['btk'],
                           zz(1, GROUP - P1_USED)], axis=1)

    # --- WP group 2: blockdiag(wm2, wg2)
    g2 = jnp.zeros((2 * NN, GROUP), f32)
    g2 = g2.at[0:NN, 0:A].set(p['wm2'])
    g2 = g2.at[NN:2 * NN, A:2 * A].set(p['wg2'])
    bp2 = jnp.concatenate([p['bm2'], p['bg2'], zz(1, GROUP - 2 * A)], axis=1)

    WP = jnp.concatenate([g0, g1, g2], axis=1)
    BIAS = jnp.concatenate([bg, b_heads, b2, bp1, bp2], axis=1)

    assert WG.shape == (INPUT_SHAPE + H, 4 * H)
    assert WH.shape == (H, GROUP)
    assert WP.shape == (2 * NN, WP_COLS)
    assert BIAS.shape == (1, BIAS_COLS)
    return {'WG': WG.astype(jnp.bfloat16), 'WH': WH.astype(jnp.bfloat16),
            'WP': WP.astype(jnp.bfloat16), 'BIAS': BIAS}


def build_constants(bs):
    """All iota-derived 0/1 selection / mask matrices, precomputed with numpy."""
    n_rows = bs * NA
    m_rows = n_rows * NA
    mr = np.arange(m_rows)
    nr = np.arange(n_rows)

    keep = np.zeros((m_rows, H + 2 * NL), np.float32)
    keep[:, :H] = 1.0
    blk = mr % NA                       # receiver j at pair row r = (b*nA + i)*nA + j
    for off in (H, H + NL):
        for d in range(L):
            keep[mr, off + blk * L + d] = 1.0

    S = np.zeros((m_rows, n_rows), np.float32)          # pair row r <- agent row r // nA
    S[mr, mr // NA] = 1.0
    y_sel = np.zeros((m_rows, NA), np.float32)          # sender one-hot (i)
    y_sel[mr, (mr // NA) % NA] = 1.0
    onehot_j = np.zeros((m_rows, NA), np.float32)       # receiver one-hot (j)
    onehot_j[mr, mr % NA] = 1.0

    used_m = H + 2 * NL + n_rows + 2 * NA
    cm_cols = max(GROUP, -(-used_m // GROUP) * GROUP)
    CM = np.zeros((m_rows, cm_cols), np.float32)
    c = 0
    CM[:, c:c + H + 2 * NL] = keep
    c += H + 2 * NL
    CM[:, c:c + n_rows] = S
    c += n_rows
    CM[:, c:c + NA] = y_sel
    c += NA
    CM[:, c:c + NA] = onehot_j

    m0 = ((mr[None, :] // (NA * NA)) == (nr[:, None] // NA)) & \
         ((mr[None, :] % NA) == (nr[:, None] % NA))
    diag = (np.arange(NA)[None, :] == (nr[:, None] % NA))
    used_n = m_rows + NA
    cn_cols = max(GROUP, -(-used_n // GROUP) * GROUP)
    CN = np.zeros((n_rows, cn_cols), np.float32)
    CN[:, 0:m_rows] = m0.astype(np.float32)
    CN[:, m_rows:m_rows + NA] = diag.astype(np.float32)
    return {'CM': jnp.asarray(CM), 'CN': jnp.asarray(CN)}


# ------------------------------ forward wrapper -------------------------------
@functools.partial(jax.jit, static_argnames=("bs",))
def maic_forward(packed, inputs, hidden_state, bs):
    """Test-mode MAICAgent forward. Returns (return_q, return_g_q, h)."""
    n_rows = bs * NA
    h_in = hidden_state.reshape(n_rows, H)
    xh = jnp.concatenate([inputs, h_in], axis=-1).astype(jnp.float32)
    out = pl.pallas_call(
        functools.partial(_maic_kernel, bs),
        out_shape=jax.ShapeDtypeStruct((n_rows, OUT_W), jnp.float32),
        in_specs=[_VSPEC] * 7,
        out_specs=_VSPEC,
    )(xh, packed['WG'], packed['WH'], packed['WP'], packed['BIAS'],
      packed['CM'], packed['CN'])
    return out[:, 0:A], out[:, A:2 * A], out[:, 2 * A:2 * A + H]


# --------------------- plain-JAX reference (torch transcription) --------------
def _reference_forward(p, inputs, hidden_state, bs):
    hp = jax.lax.Precision.HIGHEST
    dot = functools.partial(jnp.dot, precision=hp)
    n = NA
    n_rows = bs * n
    m_rows = n_rows * n
    s = 1.0 / jnp.sqrt(1.0 + BN_EPS)

    x = inputs
    h_in = hidden_state.reshape(n_rows, H)
    feat = dot(x, p['wv']) + p['bv']                     # softmax over a size-1 dim == 1
    r = jax.nn.sigmoid(dot(feat, p['wir']) + p['bir'] + dot(h_in, p['whr']) + p['bhr'])
    z = jax.nn.sigmoid(dot(feat, p['wiz']) + p['biz'] + dot(h_in, p['whz']) + p['bhz'])
    c = jnp.tanh(dot(feat, p['win']) + p['bin'] + r * (dot(h_in, p['whn']) + p['bhn']))
    h = (1.0 - z) * c + z * h_in
    q_origin = dot(h, p['wfc2']) + p['bfc2']
    h_rep = jnp.repeat(h, n, axis=0)

    tiny = dot(h, p['wt']) + p['bt']
    hi = _leaky_relu(s * (dot(tiny, p['wi1']) + p['bi1']))
    infer = dot(hi, p['wi2']) + p['bi2']
    latent_i = infer[:, :NL].reshape(m_rows, L)

    hd = _leaky_relu(s * (dot(h, p['wd1']) + p['bd1']))
    demand = dot(hd, p['wd2']) + p['bd2']
    latent = demand[:, :NL].reshape(m_rows, L)

    msg = dot(_leaky_relu(dot(jnp.concatenate([h_rep, latent_i], -1), p['wm1']) + p['bm1']),
              p['wm2']) + p['bm2']
    msg = msg.reshape(bs, n, n, A)
    g_value = dot(_leaky_relu(dot(jnp.concatenate([h_rep, latent], -1), p['wg1']) + p['bg1']),
                  p['wg2']) + p['bg2']
    g_value = g_value.reshape(bs, n, n, A)

    def attn(wq_, bq_, wk_, bk_, lat):
        query = dot(h, wq_) + bq_                                      # (bs*n, AD)
        key = dot(lat, wk_) + bk_                                      # (bs*n*n, AD)
        key = key.reshape(bs, n, n, AD).transpose(0, 2, 1, 3)
        key = key.reshape(bs * n, n, AD).transpose(0, 2, 1)            # (bs*n, AD, n)
        logit = jnp.einsum('nd,ndk->nk', query / (AD ** 0.5), key,
                           precision=hp).reshape(bs, n, n)
        logit = jnp.where(jnp.eye(n, dtype=bool)[None], -1e9, logit)
        return jax.nn.softmax(logit, axis=-1)

    alpha = attn(p['wq'], p['bq'], p['wkk'], p['bkk'], latent_i)
    tar_alpha = attn(p['wtq'], p['btq'], p['wtk'], p['btk'], latent)
    alpha = jnp.where(alpha < 0.3 / n, 0.0, alpha)

    return_q = q_origin + jnp.sum(alpha[..., None] * msg, axis=1).reshape(n_rows, A)
    return_g_q = q_origin + jnp.sum(tar_alpha[..., None] * g_value, axis=1).reshape(n_rows, A)
    return return_q, return_g_q, h


# --------------------------------- main ---------------------------------------
if __name__ == "__main__":
    raw = init_params(0)
    packed = {**pack_params(raw), **build_constants(BS)}

    key = jax.random.PRNGKey(0)
    k_obs, _ = jax.random.split(key)
    inputs = jax.random.normal(k_obs, (BS * N_AGENTS, INPUT_SHAPE), jnp.float32)
    hidden = jnp.zeros((BS * N_AGENTS, RNN_HIDDEN), jnp.float32)   # init_hidden()

    return_q, return_g_q, h = maic_forward(packed, inputs, hidden, BS)
    jax.block_until_ready((return_q, return_g_q, h))

    assert return_q.shape == (BS * N_AGENTS, N_ACTIONS)
    assert return_g_q.shape == (BS * N_AGENTS, N_ACTIONS)
    assert h.shape == (BS * N_AGENTS, RNN_HIDDEN)

    # cross-check the fused bf16-weight kernel against a plain-JAX f32 transcription
    # (tolerance sized for bf16 MXU operands with f32 accumulation)
    ref_q, ref_gq, ref_h = _reference_forward(raw, inputs, hidden, BS)
    assert jnp.allclose(h, ref_h, atol=3e-2, rtol=3e-2)
    assert jnp.allclose(return_q, ref_q, atol=3e-2, rtol=3e-2)
    assert jnp.allclose(return_g_q, ref_gq, atol=3e-2, rtol=3e-2)

    print("KERNEL_OK")
</pallas_src>

<mosaic_0001>
module attributes {stable_mosaic.version = 11 : i64} {
  func.func @_maic_kernel(%arg0: memref<8x64xf32, #tpu.memory_space<vmem>>, %arg1: memref<64x128xbf16, #tpu.memory_space<vmem>>, %arg2: memref<32x128xbf16, #tpu.memory_space<vmem>>, %arg3: memref<64x384xbf16, #tpu.memory_space<vmem>>, %arg4: memref<1x640xf32, #tpu.memory_space<vmem>>, %arg5: memref<32x128xf32, #tpu.memory_space<vmem>>, %arg6: memref<8x128xf32, #tpu.memory_space<vmem>>, %arg7: memref<8x128xf32, #tpu.memory_space<vmem>>) attributes {dimension_semantics = [], scalar_prefetch = 0 : i64, scratch_operands = 0 : i64, tpu.core_type = #tpu.core_type<tc>} {
    %c0 = arith.constant 0 : index
    %c0_0 = arith.constant 0 : index
    %0 = vector.load %arg0[%c0, %c0_0] : memref<8x64xf32, #tpu.memory_space<vmem>>, vector<8x64xf32>
    %1 = vector.extract_strided_slice %0 {offsets = [0, 32], sizes = [8, 32], strides = [1, 1]} : vector<8x64xf32> to vector<8x32xf32>
    %2 = arith.truncf %0 : vector<8x64xf32> to vector<8x64xbf16>
    %c0_1 = arith.constant 0 : index
    %c0_2 = arith.constant 0 : index
    %3 = vector.load %arg1[%c0_1, %c0_2] : memref<64x128xbf16, #tpu.memory_space<vmem>>, vector<64x128xbf16>
    %cst = arith.constant dense<0.000000e+00> : vector<8x128xf32>
    %4 = tpu.matmul %2, %3, %cst {dimension_numbers = #tpu.dot_dimension_numbers<[1], [0], [0], [1], [0, 0, 1, 1], [], []>} : vector<8x64xbf16>, vector<64x128xbf16>, vector<8x128xf32> -> vector<8x128xf32>
    %c0_3 = arith.constant 0 : index
    %c0_4 = arith.constant 0 : index
    %5 = vector.load %arg4[%c0_3, %c0_4] : memref<1x640xf32, #tpu.memory_space<vmem>>, vector<1x128xf32>
    %6 = vector.broadcast %5 : vector<1x128xf32> to vector<8x128xf32>
    %7 = arith.addf %4, %6 : vector<8x128xf32>
    %8 = vector.extract_strided_slice %7 {offsets = [0, 0], sizes = [8, 32], strides = [1, 1]} : vector<8x128xf32> to vector<8x32xf32>
    %9 = arith.negf %8 : vector<8x32xf32>
    %10 = math.exp %9 : vector<8x32xf32>
    %cst_5 = arith.constant 1.000000e+00 : f32
    %11 = vector.broadcast %cst_5 : f32 to vector<8x32xf32>
    %12 = arith.addf %11, %10 : vector<8x32xf32>
    %13 = arith.divf %11, %12 : vector<8x32xf32>
    %14 = vector.extract_strided_slice %7 {offsets = [0, 32], sizes = [8, 32], strides = [1, 1]} : vector<8x128xf32> to vector<8x32xf32>
    %15 = arith.negf %14 : vector<8x32xf32>
    %16 = math.exp %15 : vector<8x32xf32>
    %cst_6 = arith.constant 1.000000e+00 : f32
    %17 = vector.broadcast %cst_6 : f32 to vector<8x32xf32>
    %18 = arith.addf %17, %16 : vector<8x32xf32>
    %19 = arith.divf %17, %18 : vector<8x32xf32>
    %20 = vector.extract_strided_slice %7 {offsets = [0, 64], sizes = [8, 32], strides = [1, 1]} : vector<8x128xf32> to vector<8x32xf32>
    %21 = vector.extract_strided_slice %7 {offsets = [0, 96], sizes = [8, 32], strides = [1, 1]} : vector<8x128xf32> to vector<8x32xf32>
    %22 = arith.mulf %13, %21 : vector<8x32xf32>
    %23 = arith.addf %20, %22 : vector<8x32xf32>
    %24 = math.tanh %23 : vector<8x32xf32>
    %cst_7 = arith.constant 1.000000e+00 : f32
    %25 = vector.broadcast %cst_7 : f32 to vector<8x32xf32>
    %26 = arith.subf %25, %19 : vector<8x32xf32>
    %27 = arith.mulf %26, %24 : vector<8x32xf32>
    %28 = arith.mulf %19, %1 : vector<8x32xf32>
    %29 = arith.addf %27, %28 : vector<8x32xf32>
    %30 = arith.truncf %29 : vector<8x32xf32> to vector<8x32xbf16>
    %c0_8 = arith.constant 0 : index
    %c0_9 = arith.constant 0 : index
    %31 = vector.load %arg2[%c0_8, %c0_9] : memref<32x128xbf16, #tpu.memory_space<vmem>>, vector<32x128xbf16>
    %cst_10 = arith.constant dense<0.000000e+00> : vector<8x128xf32>
    %32 = tpu.matmul %30, %31, %cst_10 {dimension_numbers = #tpu.dot_dimension_numbers<[1], [0], [0], [1], [0, 0, 1, 1], [], []>} : vector<8x32xbf16>, vector<32x128xbf16>, vector<8x128xf32> -> vector<8x128xf32>
    %c0_11 = arith.constant 0 : index
    %c128 = arith.constant 128 : index
    %33 = vector.load %arg4[%c0_11, %c128] : memref<1x640xf32, #tpu.memory_space<vmem>>, vector<1x128xf32>
    %34 = vector.broadcast %33 : vector<1x128xf32> to vector<8x128xf32>
    %35 = arith.addf %32, %34 : vector<8x128xf32>
    %36 = vector.extract_strided_slice %35 {offsets = [0, 0], sizes = [8, 8], strides = [1, 1]} : vector<8x128xf32> to vector<8x8xf32>
    %37 = vector.extract_strided_slice %35 {offsets = [0, 8], sizes = [8, 64], strides = [1, 1]} : vector<8x128xf32> to vector<8x64xf32>
    %cst_12 = arith.constant 0.000000e+00 : f32
    %38 = vector.broadcast %cst_12 : f32 to vector<8x64xf32>
    %39 = arith.cmpf oge, %37, %38 : vector<8x64xf32>
    %cst_13 = arith.constant 0.00999999977 : f32
    %40 = vector.broadcast %cst_13 : f32 to vector<8x64xf32>
    %41 = arith.mulf %40, %37 : vector<8x64xf32>
    %42 = arith.select %39, %37, %41 : vector<8x64xi1>, vector<8x64xf32>
    %43 = vector.extract_strided_slice %35 {offsets = [0, 72], sizes = [8, 16], strides = [1, 1]} : vector<8x128xf32> to vector<8x16xf32>
    %44 = vector.extract_strided_slice %35 {offsets = [0, 88], sizes = [8, 16], strides = [1, 1]} : vector<8x128xf32> to vector<8x16xf32>
    %45 = arith.truncf %42 : vector<8x64xf32> to vector<8x64xbf16>
    %c0_14 = arith.constant 0 : index
    %c0_15 = arith.constant 0 : index
    %46 = vector.load %arg3[%c0_14, %c0_15] : memref<64x384xbf16, #tpu.memory_space<vmem>>, vector<64x32xbf16>
    %cst_16 = arith.constant dense<0.000000e+00> : vector<8x32xf32>
    %47 = tpu.matmul %45, %46, %cst_16 {dimension_numbers = #tpu.dot_dimension_numbers<[1], [0], [0], [1], [0, 0, 1, 1], [], []>} : vector<8x64xbf16>, vector<64x32xbf16>, vector<8x32xf32> -> vector<8x32xf32>
    %c0_17 = arith.constant 0 : index
    %c256 = arith.constant 256 : index
    %48 = vector.load %arg4[%c0_17, %c256] : memref<1x640xf32, #tpu.memory_space<vmem>>, vector<1x32xf32>
    %49 = vector.broadcast %48 : vector<1x32xf32> to vector<8x32xf32>
    %50 = arith.addf %47, %49 : vector<8x32xf32>
    %51 = tpu.concatenate %29, %50 in 1 : vector<8x32xf32>, vector<8x32xf32> -> vector<8x64xf32>
    %c0_18 = arith.constant 0 : index
    %c64 = arith.constant 64 : index
    %52 = vector.load %arg5[%c0_18, %c64] : memref<32x128xf32, #tpu.memory_space<vmem>>, vector<32x8xf32>
    %c0_19 = arith.constant 0 : index
    %c0_20 = arith.constant 0 : index
    %53 = vector.load %arg5[%c0_19, %c0_20] : memref<32x128xf32, #tpu.memory_space<vmem>>, vector<32x64xf32>
    %cst_21 = arith.constant dense<0.000000e+00> : vector<32x64xf32>
    %54 = tpu.matmul %52, %51, %cst_21 {dimension_numbers = #tpu.dot_dimension_numbers<[1], [0], [0], [1], [0, 0, 1, 1], [], []>} : vector<32x8xf32>, vector<8x64xf32>, vector<32x64xf32> -> vector<32x64xf32>
    %55 = arith.mulf %54, %53 : vector<32x64xf32>
    %56 = arith.truncf %55 : vector<32x64xf32> to vector<32x64xbf16>
    %c0_22 = arith.constant 0 : index
    %c128_23 = arith.constant 128 : index
    %57 = vector.load %arg3[%c0_22, %c128_23] : memref<64x384xbf16, #tpu.memory_space<vmem>>, vector<64x96xbf16>
    %cst_24 = arith.constant dense<0.000000e+00> : vector<32x96xf32>
    %58 = tpu.matmul %56, %57, %cst_24 {dimension_numbers = #tpu.dot_dimension_numbers<[1], [0], [0], [1], [0, 0, 1, 1], [], []>} : vector<32x64xbf16>, vector<64x96xbf16>, vector<32x96xf32> -> vector<32x96xf32>
    %c0_25 = arith.constant 0 : index
    %c384 = arith.constant 384 : index
    %59 = vector.load %arg4[%c0_25, %c384] : memref<1x640xf32, #tpu.memory_space<vmem>>, vector<1x96xf32>
    %60 = vector.broadcast %59 : vector<1x96xf32> to vector<32x96xf32>
    %61 = arith.addf %58, %60 : vector<32x96xf32>
    %62 = vector.extract_strided_slice %61 {offsets = [0, 0], sizes = [32, 64], strides = [1, 1]} : vector<32x96xf32> to vector<32x64xf32>
    %cst_26 = arith.constant 0.000000e+00 : f32
    %63 = vector.broadcast %cst_26 : f32 to vector<32x64xf32>
    %64 = arith.cmpf oge, %62, %63 : vector<32x64xf32>
    %cst_27 = arith.constant 0.00999999977 : f32
    %65 = vector.broadcast %cst_27 : f32 to vector<32x64xf32>
    %66 = arith.mulf %65, %62 : vector<32x64xf32>
    %67 = arith.select %64, %62, %66 : vector<32x64xi1>, vector<32x64xf32>
    %68 = vector.extract_strided_slice %61 {offsets = [0, 64], sizes = [32, 16], strides = [1, 1]} : vector<32x96xf32> to vector<32x16xf32>
    %69 = vector.extract_strided_slice %61 {offsets = [0, 80], sizes = [32, 16], strides = [1, 1]} : vector<32x96xf32> to vector<32x16xf32>
    %70 = arith.truncf %67 : vector<32x64xf32> to vector<32x64xbf16>
    %c0_28 = arith.constant 0 : index
    %c256_29 = arith.constant 256 : index
    %71 = vector.load %arg3[%c0_28, %c256_29] : memref<64x384xbf16, #tpu.memory_space<vmem>>, vector<64x16xbf16>
    %cst_30 = arith.constant dense<0.000000e+00> : vector<32x16xf32>
    %72 = tpu.matmul %70, %71, %cst_30 {dimension_numbers = #tpu.dot_dimension_numbers<[1], [0], [0], [1], [0, 0, 1, 1], [], []>} : vector<32x64xbf16>, vector<64x16xbf16>, vector<32x16xf32> -> vector<32x16xf32>
    %c0_31 = arith.constant 0 : index
    %c512 = arith.constant 512 : index
    %73 = vector.load %arg4[%c0_31, %c512] : memref<1x640xf32, #tpu.memory_space<vmem>>, vector<1x16xf32>
    %74 = vector.broadcast %73 : vector<1x16xf32> to vector<32x16xf32>
    %75 = arith.addf %72, %74 : vector<32x16xf32>
    %76 = vector.extract_strided_slice %75 {offsets = [0, 0], sizes = [32, 8], strides = [1, 1]} : vector<32x16xf32> to vector<32x8xf32>
    %77 = vector.extract_strided_slice %75 {offsets = [0, 8], sizes = [32, 8], strides = [1, 1]} : vector<32x16xf32> to vector<32x8xf32>
    %cst_32 = arith.constant dense<0.000000e+00> : vector<8x32xf32>
    %78 = tpu.matmul %43, %68, %cst_32 {dimension_numbers = #tpu.dot_dimension_numbers<[1], [1], [0], [0], [0, 0, 1, 0], [], []>} : vector<8x16xf32>, vector<32x16xf32>, vector<8x32xf32> -> vector<8x32xf32>
    %cst_33 = arith.constant dense<0.000000e+00> : vector<8x32xf32>
    %79 = tpu.matmul %44, %69, %cst_33 {dimension_numbers = #tpu.dot_dimension_numbers<[1], [1], [0], [0], [0, 0, 1, 0], [], []>} : vector<8x16xf32>, vector<32x16xf32>, vector<8x32xf32> -> vector<8x32xf32>
    %c0_34 = arith.constant 0 : index
    %c0_35 = arith.constant 0 : index
    %80 = vector.load %arg6[%c0_34, %c0_35] : memref<8x128xf32, #tpu.memory_space<vmem>>, vector<8x32xf32>
    %c0_36 = arith.constant 0 : index
    %c32 = arith.constant 32 : index
    %81 = vector.load %arg6[%c0_36, %c32] : memref<8x128xf32, #tpu.memory_space<vmem>>, vector<8x4xf32>
    %c0_37 = arith.constant 0 : index
    %c72 = arith.constant 72 : index
    %82 = vector.load %arg5[%c0_37, %c72] : memref<32x128xf32, #tpu.memory_space<vmem>>, vector<32x4xf32>
    %83 = arith.mulf %78, %80 : vector<8x32xf32>
    %cst_38 = arith.constant dense<0.000000e+00> : vector<8x4xf32>
    %84 = tpu.matmul %83, %82, %cst_38 {dimension_numbers = #tpu.dot_dimension_numbers<[1], [0], [0], [1], [0, 0, 1, 1], [], []>} : vector<8x32xf32>, vector<32x4xf32>, vector<8x4xf32> -> vector<8x4xf32>
    %85 = arith.mulf %79, %80 : vector<8x32xf32>
    %cst_39 = arith.constant dense<0.000000e+00> : vector<8x4xf32>
    %86 = tpu.matmul %85, %82, %cst_39 {dimension_numbers = #tpu.dot_dimension_numbers<[1], [0], [0], [1], [0, 0, 1, 1], [], []>} : vector<8x32xf32>, vector<32x4xf32>, vector<8x4xf32> -> vector<8x4xf32>
    %cst_40 = arith.constant 5.000000e-01 : f32
    %87 = vector.broadcast %cst_40 : f32 to vector<8x4xf32>
    %88 = arith.cmpf ogt, %81, %87 : vector<8x4xf32>
    %cst_41 = arith.constant -1.000000e+09 : f32
    %89 = vector.broadcast %cst_41 : f32 to vector<8x4xf32>
    %90 = arith.select %88, %89, %84 : vector<8x4xi1>, vector<8x4xf32>
    %cst_42 = arith.constant 5.000000e-01 : f32
    %91 = vector.broadcast %cst_42 : f32 to vector<8x4xf32>
    %92 = arith.cmpf ogt, %81, %91 : vector<8x4xf32>
    %cst_43 = arith.constant -1.000000e+09 : f32
    %93 = vector.broadcast %cst_43 : f32 to vector<8x4xf32>
    %94 = arith.select %92, %93, %86 : vector<8x4xi1>, vector<8x4xf32>
    %cst_44 = arith.constant dense<0xFF800000> : vector<8xf32>
    %95 = vector.multi_reduction <maximumf>, %90, %cst_44 [1] : vector<8x4xf32> to vector<8xf32>
    %96 = vector.shape_cast %95 : vector<8xf32> to vector<8x1xf32>
    %97 = vector.broadcast %96 : vector<8x1xf32> to vector<8x4xf32>
    %98 = arith.subf %90, %97 : vector<8x4xf32>
    %99 = math.exp %98 : vector<8x4xf32>
    %cst_45 = arith.constant dense<0.000000e+00> : vector<8xf32>
    %100 = vector.multi_reduction <add>, %99, %cst_45 [1] : vector<8x4xf32> to vector<8xf32>
    %101 = vector.shape_cast %100 : vector<8xf32> to vector<8x1xf32>
    %102 = tpu.reciprocal %101 {approx = true} : vector<8x1xf32> -> vector<8x1xf32>
    %103 = vector.broadcast %102 : vector<8x1xf32> to vector<8x4xf32>
    %104 = arith.mulf %99, %103 : vector<8x4xf32>
    %cst_46 = arith.constant dense<0xFF800000> : vector<8xf32>
    %105 = vector.multi_reduction <maximumf>, %94, %cst_46 [1] : vector<8x4xf32> to vector<8xf32>
    %106 = vector.shape_cast %105 : vector<8xf32> to vector<8x1xf32>
    %107 = vector.broadcast %106 : vector<8x1xf32> to vector<8x4xf32>
    %108 = arith.subf %94, %107 : vector<8x4xf32>
    %109 = math.exp %108 : vector<8x4xf32>
    %cst_47 = arith.constant dense<0.000000e+00> : vector<8xf32>
    %110 = vector.multi_reduction <add>, %109, %cst_47 [1] : vector<8x4xf32> to vector<8xf32>
    %111 = vector.shape_cast %110 : vector<8xf32> to vector<8x1xf32>
    %112 = tpu.reciprocal %111 {approx = true} : vector<8x1xf32> -> vector<8x1xf32>
    %113 = vector.broadcast %112 : vector<8x1xf32> to vector<8x4xf32>
    %114 = arith.mulf %109, %113 : vector<8x4xf32>
    %cst_48 = arith.constant 7.500000e-02 : f32
    %115 = vector.broadcast %cst_48 : f32 to vector<8x4xf32>
    %116 = arith.cmpf olt, %104, %115 : vector<8x4xf32>
    %cst_49 = arith.constant 0.000000e+00 : f32
    %117 = vector.broadcast %cst_49 : f32 to vector<8x4xf32>
    %118 = arith.select %116, %117, %104 : vector<8x4xi1>, vector<8x4xf32>
    %c0_50 = arith.constant 0 : index
    %c76 = arith.constant 76 : index
    %119 = vector.load %arg5[%c0_50, %c76] : memref<32x128xf32, #tpu.memory_space<vmem>>, vector<32x4xf32>
    %120 = tpu.concatenate %118, %114 in 1 : vector<8x4xf32>, vector<8x4xf32> -> vector<8x8xf32>
    %cst_51 = arith.constant dense<0.000000e+00> : vector<32x8xf32>
    %121 = tpu.matmul %52, %120, %cst_51 {dimension_numbers = #tpu.dot_dimension_numbers<[1], [0], [0], [1], [0, 0, 1, 1], [], []>} : vector<32x8xf32>, vector<8x8xf32>, vector<32x8xf32> -> vector<32x8xf32>
    %122 = vector.extract_strided_slice %121 {offsets = [0, 0], sizes = [32, 4], strides = [1, 1]} : vector<32x8xf32> to vector<32x4xf32>
    %123 = arith.mulf %122, %119 : vector<32x4xf32>
    %cst_52 = arith.constant dense<0.000000e+00> : vector<32xf32>
    %124 = vector.multi_reduction <add>, %123, %cst_52 [1] : vector<32x4xf32> to vector<32xf32>
    %125 = vector.shape_cast %124 : vector<32xf32> to vector<32x1xf32>
    %126 = vector.extract_strided_slice %121 {offsets = [0, 4], sizes = [32, 4], strides = [1, 1]} : vector<32x8xf32> to vector<32x4xf32>
    %127 = arith.mulf %126, %119 : vector<32x4xf32>
    %cst_53 = arith.constant dense<0.000000e+00> : vector<32xf32>
    %128 = vector.multi_reduction <add>, %127, %cst_53 [1] : vector<32x4xf32> to vector<32xf32>
    %129 = vector.shape_cast %128 : vector<32xf32> to vector<32x1xf32>
    %130 = vector.broadcast %125 : vector<32x1xf32> to vector<32x8xf32>
    %131 = arith.mulf %130, %76 : vector<32x8xf32>
    %132 = vector.broadcast %129 : vector<32x1xf32> to vector<32x8xf32>
    %133 = arith.mulf %132, %77 : vector<32x8xf32>
    %134 = tpu.concatenate %131, %133 in 1 : vector<32x8xf32>, vector<32x8xf32> -> vector<32x16xf32>
    %cst_54 = arith.constant dense<0.000000e+00> : vector<8x16xf32>
    %135 = tpu.matmul %80, %134, %cst_54 {dimension_numbers = #tpu.dot_dimension_numbers<[1], [0], [0], [1], [0, 0, 1, 1], [], []>} : vector<8x32xf32>, vector<32x16xf32>, vector<8x16xf32> -> vector<8x16xf32>
    %136 = vector.extract_strided_slice %135 {offsets = [0, 0], sizes = [8, 8], strides = [1, 1]} : vector<8x16xf32> to vector<8x8xf32>
    %137 = arith.addf %36, %136 : vector<8x8xf32>
    %138 = vector.extract_strided_slice %135 {offsets = [0, 8], sizes = [8, 8], strides = [1, 1]} : vector<8x16xf32> to vector<8x8xf32>
    %139 = arith.addf %36, %138 : vector<8x8xf32>
    %cst_55 = arith.constant 0.000000e+00 : f32
    %140 = vector.broadcast %cst_55 : f32 to vector<8x80xf32>
    %141 = tpu.concatenate %137, %139, %29, %140 in 1 : vector<8x8xf32>, vector<8x8xf32>, vector<8x32xf32>, vector<8x80xf32> -> vector<8x128xf32>
    %c0_56 = arith.constant 0 : index
    %c0_57 = arith.constant 0 : index
    %142 = vector.load %arg7[%c0_56, %c0_57] : memref<8x128xf32, #tpu.memory_space<vmem>>, vector<8x128xf32>
    tpu.vector_store %arg7[%c0_56, %c0_57], %141 {strides = array<i32>} : memref<8x128xf32, #tpu.memory_space<vmem>>, vector<8x128xf32>,
    return
  }
}

</mosaic_0001>

<bundles_post_ra>
// kernel: maic_forward.1
= control target key start
LH: loop header
LB: loop body
LE: loop exit
PB: predicated region body
PF: predicated region fallthrough
CT: control target
= control target key end

     0   :  { %12 = vsyncpa [#allocation3], 0  ;;  %s2166_s0 = inlined_call_operand.vmem [shape: f32[8,64], index: 0, kind: input, shape index: {}]   ;;  %s2167_s1 = inlined_call_operand.hbm [shape: bf16[64,128], index: 1, kind: input, shape index: {}]   ;;  %s2168_s2 = inlined_call_operand.hbm [shape: bf16[32,128], index: 2, kind: input, shape index: {}]   ;;  %s2169_s3 = inlined_call_operand.hbm [shape: bf16[64,384], index: 3, kind: input, shape index: {}]   ;;  %s2170_s4 = inlined_call_operand.hbm [shape: f32[1,640], index: 4, kind: input, shape index: {}]   ;;  %s2171_s5 = inlined_call_operand.vmem [shape: f32[32,128], index: 5, kind: input, shape index: {}]   ;;  %s2172_s6 = inlined_call_operand.hbm [shape: f32[8,128], index: 6, kind: input, shape index: {}]   ;;  %s2173_s7 = inlined_call_operand.vmem [shape: f32[8,128], index: 7, kind: output, shape index: {}]  }
   0x1   :  { %13 = vsyncpa [#allocation5], 0 }
   0x2   :  { %14 = vsyncpa [#allocation8], 0  ;;  %s1808_s24 = smov [#allocation4]   ;;  %s1809_s26 = smov [#allocation7]  }
   0x3   :  { %s34_s25 = sshll.u32 %s1808_s24, 4  ;;  %s59_s27 = sshll.u32 %s1809_s26, 4  ;;  %s35_s25 = int_to_ptr.vmem [resolvable:$true] %s34_s25  ;;  %s1871_s27 = int_to_ptr.vmem [resolvable:$true] %s59_s27 }
   0x4   :  { %s1692_s30 = scalar_lea.hbm %s2168_s2, 256 }
   0x5   :  { %p1693_p0 = scmp.ne.s32.totalorder %s2168_s2, %s1692_s30  ;;  %p1696_p1 = scmp.lt.u32.totalorder %s1692_s30, %s2168_s2 }
   0x7   :  { %p1698_p2 = pnand %p1696_p1, %p1693_p0 }
   0x9   :  { %1701 = shalt.err (!%p1698_p2)
}
   0xa   :  { %s1702_s12 = scalar_lea.vmem %s35_s25, 256  ;;  %p1707_p4 = scmp.lt.s32.totalorder %s35_s25, %s35_s25 }
   0xb   :  { %p1703_p3 = scmp.ne.s32.totalorder %s35_s25, %s1702_s12  ;;  %p1708_p5 = scmp.lt.s32.totalorder %s1702_s12, %s1702_s12 }
   0xd   :  { %p1709_p6 = por %p1708_p5, %p1707_p4 }
   0xf   :  { %p1710_p7 = pnand %p1709_p6, %p1703_p3 }
  0x11   :  { %1713 = shalt.err (!%p1710_p7)
}
  0x12   :  { %s1810_s13 = smov 64   ;;  %s1811_s14 = smov 4  }
  0x13   :  { %40 = dma.hbm_to_vmem [thread:$0]  %s2168_s2, 256, %s35_s25, [#allocation5], %s1810_s13, %s1810_s13, %s1811_s14  }
  0x14   :  { %s1714_s19 = scalar_lea.hbm %s2170_s4, 80 }
  0x15   :  { %p1715_p8 = scmp.ne.s32.totalorder %s2170_s4, %s1714_s19  ;;  %p1718_p9 = scmp.lt.u32.totalorder %s1714_s19, %s2170_s4 }
  0x17   :  { %p1720_p10 = pnand %p1718_p9, %p1715_p8 }
  0x19   :  { %1723 = shalt.err (!%p1720_p10)
}
  0x1a   :  { %s1724_s24 = scalar_lea.vmem %s1871_s27, 80  ;;  %s1728_s2 = scalar_lea.vmem %s1871_s27, 96 }
  0x1b   :  { %p1725_p11 = scmp.ne.s32.totalorder %s1871_s27, %s1724_s24  ;;  %p1729_p12 = scmp.lt.s32.totalorder %s1871_s27, %s1871_s27 }
  0x1c   :  { %p1730_p13 = scmp.lt.s32.totalorder %s1728_s2, %s1724_s24 }
  0x1e   :  { %p1731_p0 = por %p1730_p13, %p1729_p12 }
  0x20   :  { %p1732_p1 = pnand %p1731_p0, %p1725_p11 }
  0x22   :  { %1735 = shalt.err (!%p1732_p1)
}
  0x23   :  { %62 = dma.hbm_to_vmem [thread:$0]  %s2170_s4, 80, %s1871_s27, [#allocation8]  }
  0x24   :  { %s1812_s28 = smov [#allocation2]   ;;  %s1813_s30 = smov [#allocation6]  }
  0x25   :  { %s22_s29 = sshll.u32 %s1812_s28, 4  ;;  %s46_s8 = sshll.u32 %s1813_s30, 4  ;;  %s23_s29 = int_to_ptr.vmem [resolvable:$true] %s22_s29  ;;  %s1906_s8 = int_to_ptr.vmem [resolvable:$true] %s46_s8 }
  0x26   :  { %s1736_s11 = scalar_lea.hbm %s2167_s1, 512 }
  0x27   :  { %p1737_p2 = scmp.ne.s32.totalorder %s2167_s1, %s1736_s11  ;;  %p1740_p3 = scmp.lt.u32.totalorder %s1736_s11, %s2167_s1 }
  0x29   :  { %p1742_p4 = pnand %p1740_p3, %p1737_p2 }
  0x2b   :  { %1745 = shalt.err (!%p1742_p4)
}
  0x2c   :  { %s1746_s4 = scalar_lea.vmem %s23_s29, 512  ;;  %p1751_p6 = scmp.lt.s32.totalorder %s23_s29, %s23_s29 }
  0x2d   :  { %p1747_p5 = scmp.ne.s32.totalorder %s23_s29, %s1746_s4  ;;  %p1752_p7 = scmp.lt.s32.totalorder %s1746_s4, %s1746_s4 }
  0x2f   :  { %p1753_p8 = por %p1752_p7, %p1751_p6 }
  0x31   :  { %p1754_p9 = pnand %p1753_p8, %p1747_p5 }
  0x33   :  { %1757 = shalt.err (!%p1754_p9)
}
  0x34   :  { %28 = dma.hbm_to_vmem [thread:$0]  %s2167_s1, 512, %s23_s29, [#allocation3], %s1810_s13, %s1810_s13, %s1811_s14  }
  0x35   :  { %s1758_s21 = scalar_lea.hbm %s2169_s3, 1536 }
  0x36   :  { %p1759_p10 = scmp.ne.s32.totalorder %s2169_s3, %s1758_s21  ;;  %p1762_p11 = scmp.lt.u32.totalorder %s1758_s21, %s2169_s3 }
  0x38   :  { %p1764_p12 = pnand %p1762_p11, %p1759_p10 }
  0x3a   :  { %1767 = shalt.err (!%p1764_p12)
}
  0x3b   :  { %s1768_s25 = scalar_lea.vmem %s1906_s8, 1536  ;;  %p1773_p0 = scmp.lt.s32.totalorder %s1906_s8, %s1906_s8 }
  0x3c   :  { %p1769_p13 = scmp.ne.s32.totalorder %s1906_s8, %s1768_s25  ;;  %p1774_p1 = scmp.lt.s32.totalorder %s1768_s25, %s1768_s25 }
  0x3e   :  { %p1775_p2 = por %p1774_p1, %p1773_p0 }
  0x40   :  { %p1776_p3 = pnand %p1775_p2, %p1769_p13 }
  0x42   :  { %1779 = shalt.err (!%p1776_p3)
}
  0x43   :  { %s1814_s1 = smov 192   ;;  %s1815_s14 = smov 12  }
  0x44   :  { %52 = dma.hbm_to_vmem [thread:$0]  %s2169_s3, 1536, %s1906_s8, [#allocation5], %s1814_s1, %s1814_s1, %s1815_s14  }
  0x45   :  { %s1816_s29 = smov [#allocation9]   ;;  %s1780_s11 = scalar_lea.hbm %s2172_s6, 128 }
  0x46   :  { %s71_s30 = sshll.u32 %s1816_s29, 4  ;;  %p1781_p4 = scmp.ne.s32.totalorder %s2172_s6, %s1780_s11  ;;  %s72_s30 = int_to_ptr.vmem [resolvable:$true] %s71_s30 }
  0x47   :  { %p1784_p5 = scmp.lt.u32.totalorder %s1780_s11, %s2172_s6 }
  0x49   :  { %p1786_p6 = pnand %p1784_p5, %p1781_p4 }
  0x4b   :  { %1789 = shalt.err (!%p1786_p6)
}
  0x4c   :  { %s1790_s4 = scalar_lea.vmem %s72_s30, 128  ;;  %p1795_p8 = scmp.lt.s32.totalorder %s72_s30, %s72_s30 }
  0x4d   :  { %p1791_p7 = scmp.ne.s32.totalorder %s72_s30, %s1790_s4  ;;  %p1796_p9 = scmp.lt.s32.totalorder %s1790_s4, %s1790_s4 }
  0x4f   :  { %p1797_p10 = por %p1796_p9, %p1795_p8 }
  0x51   :  { %p1798_p11 = pnand %p1797_p10, %p1791_p7 }
  0x53   :  { %1801 = shalt.err (!%p1798_p11)
}
  0x54   :  { %74 = dma.hbm_to_vmem [thread:$0]  %s2172_s6, 128, %s72_s30, [#allocation8]  }
  0x55   :  { %1802 = dma.done.wait [#allocation3], 512  }
  0x56   :  { %1803 = vsyncadd [#allocation3], 4294966784 }
  0x57   :  { %1804 = dma.done.wait [#allocation5], 1792  }
  0x58   :  { %1805 = vsyncadd [#allocation5], 4294965504 }
  0x59   :  { %1806 = dma.done.wait [#allocation8], 208  }
  0x5a   :  { %1807 = vsyncadd [#allocation8], 4294967088  ;;  %v1817_v0 = vmov 0.0   ;;  %vm1818_vm0 = vmmov 0   ;;  %v1660_v1 = vld [vmem:[#allocation2] sm:$0xff]   ;;  %v1661_v2 = vld [vmem:[#allocation2 + $0x8] sm:$0xff]  }
  0x5b   :  { %1456 = vmatprep.subr.bf16.mxu0 %v1817_v0  ;;  %1464 = vmatprep.mubr.msk.bf16.mxu0 %vm1818_vm0, %v1817_v0  ;;  %v1662_v3 = vld [vmem:[#allocation2 + $0x10] sm:$0xff]   ;;  %v1663_v4 = vld [vmem:[#allocation2 + $0x18] sm:$0xff]   ;;  %v91_v5 = vld [vmem:[%s2166_s0] sm:$0xff]  ;;  %vm132_vm1 = vcmask 523264   ;;  %s1819_s18 = smov 32   ;;  %s1820_s0 = smov 96  }
  0x5c   :  { %1468 = vmatprep.subr.bf16.mxu1 %v1817_v0  ;;  %1472 = vmatprep.mubr.msk.bf16.mxu1 %vm1818_vm0, %v1817_v0  ;;  %v92_v6 = vpack.c.bf16 %v91_v5, %v91_v5  ;;  %v1344_v7 = vld [vmem:[#allocation7] ss:$0 sm:$0xff]  ;;  %v1664_v21 = vld [vmem:[#allocation4] sm:$0xff]   ;;  %v1665_v23 = vld [vmem:[#allocation4 + $0x8] sm:$0xff]   ;;  %vm228_vm2 = vcmask 261120   ;;  %s1821_s19 = smov 120  }
  0x5d   :  { %1457 = vmatpush3.bf16.msra.mxu0 %v1660_v1  ;;  %1469 = vmatpush3.bf16.msra.mxu1 %v1664_v21  ;;  %v1666_v31 = vld [vmem:[#allocation6] ss:$12 sps:$4 sm:$0xff]   ;;  %v1667_v32 = vld [vmem:[#allocation6 + $0x18] ss:$12 sps:$4 sm:$0xff]   ;;  %v1668_v33 = vld [vmem:[#allocation6 + $0x30] ss:$12 sps:$4 sm:$0xff]  }
  0x5e   :  { %1458 = vmatprep.subr.bf16.mxu0 %v1817_v0  ;;  %1470 = vmatprep.subr.bf16.mxu1 %v1817_v0  ;;  %v1669_v34 = vld [vmem:[#allocation6 + $0x48] ss:$12 sps:$4 sm:$0xff]   ;;  %v1351_v35 = vld [vmem:[#allocation7 + $0x1] ss:$0 sm:$0xff]  ;;  %vm386_vm4 = vcmask 64512   ;;  %v2012_v55 = vld [vmem:[%s2171_s5 + $0x8] sm:$0xff] }
  0x5f   :  { %v1993_v45 = vld [vmem:[%s2171_s5] sm:$0xff]  ;;  %v2000_v46 = vld [vmem:[%s2171_s5 + $0x10] sm:$0xff]  ;;  %v2019_v56 = vld [vmem:[%s2171_s5 + $0x18] sm:$0xff]  ;;  %s1823_s5 = smov 48   ;;  %s1824_s14 = smov 40   ;;  %vm703_vm9 = vcmask 130048  }
  0x60   :  { %v1355_v49 = vld [vmem:[#allocation7 + $0x2] ss:$0 sm:$0xff]  ;;  %v1670_v58 = vld [vmem:[#allocation6 + $0x4] ss:$12 sps:$4 sm:$0xff]   ;;  %v1671_v61 = vld [vmem:[#allocation6 + $0x1c] ss:$12 sps:$4 sm:$0xff]  }
  0x61   :  { %1459 = vmatpush3.bf16.msra.mxu0 %v1661_v2  ;;  %1471 = vmatpush3.bf16.msra.mxu1 %v1665_v23  ;;  %v1672_v1 = vld [vmem:[#allocation6 + $0x34] ss:$12 sps:$4 sm:$0xff]   ;;  %v1673_v2 = vld [vmem:[#allocation6 + $0x4c] ss:$12 sps:$4 sm:$0xff]   ;;  %s1825_s26 = smov 56   ;;  %vm2060_vm10 = vmpackc.low %vm703_vm9, %vm703_vm9  ;;  %vm1046_vm12 = vcmask 294144  }
  0x62   :  { %1460 = vmatprep.subr.bf16.mxu0 %v1817_v0  ;;  %1476 = vmatprep.subr.bf16.mxu1 %v1817_v0  ;;  %vm1057_vm13 = vcmask 31744   ;;  %s1827_s28 = smov 52   ;;  %s1828_s29 = smov 124   ;;  %vm1334_vm15 = vcmask 392192  }
  0x63   :  { %s1829_s30 = smov 8   ;;  %s1830_s9 = smov 112  }
  0x65   :  { %1461 = vmatpush3.bf16.msra.mxu0 %v1662_v3  ;;  %v1674_v3 = vld [vmem:[#allocation6 + $0x8] ss:$12 sps:$4 sm:$0xff]  }
  0x66   :  { %1462 = vmatprep.subr.bf16.mxu0 %v1817_v0 }
  0x69   :  { %1463 = vmatpush3.bf16.msra.mxu0 %v1663_v4 }
  0x6c   :  { %1465 = vmatmul.mubr.msk.bf16.vlgmr.msra.gmra.mrb[0].mxu0 %vm132_vm1, %v92_v6 }
 0x13f   :  { %v170_v8 = vpop.f32.mrb[0].mxu0 }
 0x140   :  { %v171_v9 = vadd.f32 %v1344_v7, %v170_v8  ;;  %v1466_v10 = vpop.f32.mrb[1].mxu0 }
 0x141   :  { %v173_v11 = vpop.f32.mrb[2].mxu0 }
 0x142   :  { %183 = vrot.lane.b32.xlu0 %v171_v9, %s1819_s18  ;;  %v1467_v12 = vpop.f32.mrb[3].mxu0  ;;  %v1350_v13 = vmul.f32 -1.442695, %v171_v9 }
 0x144   :  { %1678 = vpow2.f32 %v1350_v13 }
 0x14e   :  { %v1679_v14 = vpop.eup %1678 }
 0x14f   :  { %v179_v15 = vadd.f32 1.0, %v1679_v14  ;;  %v1675_v14 = vld [vmem:[#allocation6 + $0x20] ss:$12 sps:$4 sm:$0xff]  }
 0x151   :  { %1680 = vrcp.f32 %v179_v15  ;;  %v1676_v15 = vld [vmem:[#allocation6 + $0x38] ss:$12 sps:$4 sm:$0xff]  }
 0x15b   :  { %v1681_v16 = vpop.eup %1680 }
 0x15c   :  { %v193_v24 = vsub.f32 1.0, %v1681_v16  ;;  %v199_v26 = vmul.f32 %v1681_v16, %v91_v5 }
 0x1b4   :  { %v184_v17 = vpop.permute.xlu0 %183 }
 0x1b5   :  { %v186_v18 = vmul.f32 %v1681_v16, %v184_v17  ;;  %v1677_v16 = vld [vmem:[#allocation6 + $0x50] ss:$12 sps:$4 sm:$0xff]   ;;  %v1365_v17 = vld [vmem:[#allocation7 + $0x3] ss:$0 sm:$0xff] }
 0x1b7   :  { %188 = vrot.lane.b32.xlu0 %v186_v18, %s1810_s13  ;;  %v1822_v18 = vmov 0.0|0.0  }
 0x229   :  { %v189_v19 = vpop.permute.xlu0 %188 }
 0x22a   :  { %v191_v20 = vadd.f32 %v189_v19, %v171_v9 }
 0x22c   :  { %1682 = vtanh.f32 %v191_v20 }
 0x236   :  { %v1683_v22 = vpop.eup %1682 }
 0x237   :  { %195 = vrot.lane.b32.xlu1 %v1683_v22, %s1820_s0 }
 0x2a9   :  { %v196_v25 = vpop.permute.xlu1 %195 }
 0x2aa   :  { %v198_v27 = vmul.f32 %v196_v25, %v193_v24 }
 0x2ac   :  { %v1970_v28 = vadd.f32 %v199_v26, %v198_v27 }
 0x2ae   :  { %v201_v29 = vpack.c.bf16 %v1970_v28, %v1970_v28 }
 0x2b0   :  { %214 = vrot.lane.b32.xlu1 %v201_v29, %s1820_s0 }
 0x2b4   :  { %362 = vrot.lane.b32.xlu1 %v1970_v28, %s1820_s0 }
 0x2b8   :  { %378 = vrot.lane.b32.xlu1 %v1993_v45, %s1810_s13 }
 0x2bc   :  { %382 = vrot.lane.b32.xlu1 %v2000_v46, %s1810_s13 }
 0x322   :  { %v215_v30 = vpop.permute.xlu1 %214 }
 0x323   :  { %1473 = vmatmul.mubr.msk.bf16.vlgmr.msra.gmra.mrb[0].mxu1 %vm228_vm2, %v215_v30 }
 0x324   :  { %1484 = vmatprep.mubr.msk.bf16.mxu1 %vm1818_vm0, %v1817_v0  ;;  %1477 = vmatpush3.bf16.msra.mxu1 %v1666_v31 }
 0x325   :  { %1478 = vmatprep.subr.bf16.mxu1 %v1817_v0 }
 0x326   :  { %v363_v47 = vpop.permute.xlu1 %362 }
 0x328   :  { %1479 = vmatpush3.bf16.msra.mxu1 %v1667_v32 }
 0x329   :  { %1480 = vmatprep.subr.bf16.mxu1 %v1817_v0 }
 0x32a   :  { %v2004_v48 = vpop.permute.xlu1 %378 }
 0x32b   :  { %1490 = vmatprep.mubr.msk.f32.mxu0 %vm386_vm4, %v2004_v48 }
 0x32c   :  { %1481 = vmatpush3.bf16.msra.mxu1 %v1668_v33 }
 0x32d   :  { %1482 = vmatprep.subr.bf16.mxu1 %v1817_v0 }
 0x32e   :  { %v2024_v60 = vpop.permute.xlu1 %382 }
 0x330   :  { %1483 = vmatpush3.bf16.msra.mxu1 %v1669_v34 }
 0x331   :  { %1508 = vmatprep.subr.bf16.mxu1 %v1674_v3 }
 0x3f6   :  { %v266_v36 = vpop.f32.mrb[0].mxu1 }
 0x3f7   :  { %v1983_v37 = vadd.f32 %v1351_v35, %v266_v36  ;;  %v1474_v38 = vpop.f32.mrb[1].mxu1 }
 0x3f8   :  { %v269_v39 = vpop.f32.mrb[2].mxu1 }
 0x3f9   :  { %v1475_v40 = vpop.f32.mrb[3].mxu1  ;;  %vm272_vm3 = vcmp.ge.f32.partialorder %v1983_v37, 0.0  ;;  %v273_v41 = vmul.f32 0.01, %v1983_v37 }
 0x3fb   :  { %v274_v42 = vsel %vm272_vm3, %v1983_v37, %v273_v41 }
 0x3fc   :  { %v275_v43 = vpack.c.bf16 %v274_v42, %v274_v42 }
 0x3fe   :  { %292 = vrot.lane.b32.xlu0 %v275_v43, %s1821_s19 }
 0x470   :  { %v293_v44 = vpop.permute.xlu0 %292 }
 0x471   :  { %1485 = vmatmul.mubr.msk.bf16.vlgmr.msra.gmra.mrb[4].mxu1 %vm132_vm1, %v293_v44 }
 0x472   :  { %1509 = vmatpush3.bf16.msra.mxu1 %v1674_v3 }
 0x473   :  { %1510 = vmatprep.subr.bf16.mxu1 %v1675_v14 }
 0x476   :  { %1511 = vmatpush3.bf16.msra.mxu1 %v1675_v14 }
 0x477   :  { %1512 = vmatprep.subr.bf16.mxu1 %v1676_v15 }
 0x47a   :  { %1513 = vmatpush3.bf16.msra.mxu1 %v1676_v15  ;;  %v2105_v15 = vld [vmem:[#allocation9] sm:$0xff] }
 0x47b   :  { %1514 = vmatprep.subr.bf16.mxu1 %v1677_v16  ;;  %vm1035_vm11 = vcmp.gt.f32.partialorder %v2105_v15, 0.5 }
 0x47e   :  { %1515 = vmatpush3.bf16.msra.mxu1 %v1677_v16 }
 0x47f   :  { %1591 = vmatprep.subr.bf16.mxu1 %v1822_v18 }
 0x544   :  { %v355_v50 = vpop.f32.mrb[4].mxu1 }
 0x545   :  { %v356_v51 = vadd.f32 %v1355_v49, %v355_v50  ;;  %v1486_v52 = vpop.f32.mrb[5].mxu1 }
 0x546   :  { %v358_v53 = vpop.f32.mrb[6].mxu1 }
 0x547   :  { %366 = vrot.lane.b32.xlu0 %v356_v51, %s1819_s18  ;;  %v1487_v54 = vpop.f32.mrb[7].mxu1 }
 0x54b   :  { %380 = vrot.lane.b32.xlu0 %v2012_v55, %s1810_s13 }
 0x54f   :  { %384 = vrot.lane.b32.xlu0 %v2019_v56, %s1810_s13 }
 0x5b9   :  { %v367_v57 = vpop.permute.xlu0 %366 }
 0x5ba   :  { %v369_v59 = vsel %vm228_vm2, %v363_v47, %v367_v57 }
 0x5bb   :  { %1488 = vmatprep.subr.mxu0 %v369_v59 }
 0x5bc   :  { %1489 = vmatpush3.msra.mxu0 %v369_v59 }
 0x5bd   :  { %v2026_v62 = vpop.permute.xlu0 %380  ;;  %1496 = vmatprep.subr.bf16.mxu0 %v1670_v58 }
 0x5be   :  { %1491 = vmatmul.mubr.msk.f32.vlgmr.msra.gmra.mrb[4].mxu0 %vm386_vm4, %v2026_v62 }
 0x5bf   :  { %1493 = vmatprep.mubr.msk.f32.mxu0 %vm386_vm4, %v2024_v60  ;;  %1497 = vmatpush3.bf16.msra.mxu0 %v1670_v58 }
 0x5c0   :  { %1498 = vmatprep.subr.bf16.mxu0 %v1671_v61 }
 0x5c1   :  { %v2032_v63 = vpop.permute.xlu0 %384 }
 0x5c2   :  { %1494 = vmatmul.mubr.msk.f32.gmra.mrb[6].mxu0 %vm386_vm4, %v2032_v63 }
 0x5c3   :  { %1499 = vmatpush3.bf16.msra.mxu0 %v1671_v61 }
 0x5c4   :  { %1500 = vmatprep.subr.bf16.mxu0 %v1672_v1 }
 0x5c7   :  { %1501 = vmatpush3.bf16.msra.mxu0 %v1672_v1 }
 0x5c8   :  { %1502 = vmatprep.subr.bf16.mxu0 %v1673_v2 }
 0x5cb   :  { %1503 = vmatpush3.bf16.msra.mxu0 %v1673_v2 }
 0x5cc   :  { %1583 = vmatprep.subr.bf16.mxu0 %v1822_v18 }
 0x691   :  { %v1492_v4 = vpop.f32.mrb[4].mxu0 }
 0x692   :  { %v481_v5 = vmul.f32 %v1492_v4, %v2012_v55  ;;  %v461_v6 = vpop.f32.mrb[5].mxu0 }
 0x693   :  { %v480_v7 = vmul.f32 %v461_v6, %v1993_v45 }
 0x695   :  { %v484_v8 = vpack.c.bf16 %v481_v5, %v480_v7  ;;  %v1495_v9 = vpop.f32.mrb[6].mxu0 }
 0x696   :  { %v483_v10 = vmul.f32 %v1495_v9, %v2019_v56  ;;  %v471_v11 = vpop.f32.mrb[7].mxu0 }
 0x697   :  { %v482_v12 = vmul.f32 %v471_v11, %v2000_v46  ;;  %1504 = vmatprep.mubr.msk.bf16.mxu0 %vm132_vm1, %v484_v8 }
 0x699   :  { %v485_v13 = vpack.c.bf16 %v483_v10, %v482_v12 }
 0x69b   :  { %1505 = vmatmul.mubr.msk.bf16.vlgmr.msra.gmra.mrb[8].mxu0 %vm132_vm1, %v485_v13 }
 0x69c   :  { %1528 = vmatprep.mubr.msk.f32.mxu0 %vm1818_vm0, %v1817_v0 }
 0x76e   :  { %v1506_v19 = vpop.f32.mrb[8].mxu0 }
 0x76f   :  { %v574_v20 = vadd.f32 %v1506_v19, %v1365_v17  ;;  %v565_v21 = vpop.f32.mrb[9].mxu0 }
 0x770   :  { %v566_v22 = vadd.f32 %v1365_v17, %v565_v21  ;;  %v1507_v23 = vpop.f32.mrb[10].mxu0 }
 0x771   :  { %v586_v24 = vmul.f32 0.01, %v574_v20  ;;  %v577_v25 = vadd.f32 %v1507_v23, %v1365_v17  ;;  %v568_v26 = vpop.f32.mrb[11].mxu0  ;;  %vm582_vm5 = vcmp.ge.f32.partialorder %v574_v20, 0.0 }
 0x772   :  { %v569_v27 = vadd.f32 %v1365_v17, %v568_v26  ;;  %vm580_vm6 = vcmp.ge.f32.partialorder %v566_v22, 0.0  ;;  %v584_v29 = vmul.f32 0.01, %v566_v22 }
 0x773   :  { %vm583_vm7 = vcmp.ge.f32.partialorder %v577_v25, 0.0  ;;  %v587_v30 = vmul.f32 0.01, %v577_v25  ;;  %v1655_v31 = vpack.i.bf16 %v577_v25, %v574_v20  ;;  %v590_v34 = vsel %vm582_vm5, %v574_v20, %v586_v24 }
 0x774   :  { %v1645_v32 = vpack.i.bf16 %v569_v27, %v566_v22  ;;  %vm581_vm8 = vcmp.ge.f32.partialorder %v569_v27, 0.0  ;;  %v585_v33 = vmul.f32 0.01, %v569_v27  ;;  %v588_v36 = vsel %vm580_vm6, %v566_v22, %v584_v29 }
 0x775   :  { %v591_v35 = vsel %vm583_vm7, %v577_v25, %v587_v30 }
 0x776   :  { %1646 = vrot.lane.b32.xlu0 %v1645_v32, %s1823_s5  ;;  %1641 = vrot.lane.b32.xlu1 %v1645_v32, %s1810_s13  ;;  %v589_v38 = vsel %vm581_vm8, %v569_v27, %v585_v33  ;;  %v593_v39 = vpack.c.bf16 %v591_v35, %v590_v34 }
 0x777   :  { %v592_v40 = vpack.c.bf16 %v589_v38, %v588_v36 }
 0x779   :  { %1516 = vmatprep.mubr.msk.bf16.mxu1 %vm132_vm1, %v592_v40 }
 0x77a   :  { %1656 = vrot.lane.b32.xlu0 %v1655_v31, %s1823_s5  ;;  %1651 = vrot.lane.b32.xlu1 %v1655_v31, %s1810_s13  ;;  %s1826_s13 = smov 100  }
 0x77b   :  { %1517 = vmatmul.mubr.msk.bf16.vlgmr.msra.gmra.mrb[8].mxu1 %vm132_vm1, %v593_v39 }
 0x77c   :  { %1539 = vmatprep.mubr.msk.f32.mxu1 %vm1818_vm0, %v1817_v0 }
 0x77e   :  { %784 = vrot.lane.b32.xlu0 %v1983_v37, %s1824_s14  ;;  %689 = vrot.lane.b32.xlu1 %v1983_v37, %s1825_s26 }
 0x782   :  { %878 = vrot.lane.b32.xlu0 %v2012_v55, %s1825_s26  ;;  %876 = vrot.lane.b32.xlu1 %v1993_v45, %s1825_s26 }
 0x786   :  { %882 = vrot.lane.b32.xlu0 %v2019_v56, %s1825_s26  ;;  %880 = vrot.lane.b32.xlu1 %v2000_v46, %s1825_s26 }
 0x7e8   :  { %v1647_v41 = vpop.permute.xlu0 %1646  ;;  %v1642_v42 = vpop.permute.xlu1 %1641 }
 0x7e9   :  { %v1649_v43 = vunpack.i.h.bf16 %v1647_v41  ;;  %v1648_v44 = vunpack.i.l.bf16 %v1647_v41  ;;  %v1644_v47 = vunpack.i.h.bf16 %v1642_v42  ;;  %v1643_v49 = vunpack.i.l.bf16 %v1642_v42 }
 0x7eb   :  { %v1592_v51 = vpack.c.bf16 %v1649_v43, %v1648_v44  ;;  %v1584_v52 = vpack.c.bf16 %v1644_v47, %v1643_v49 }
 0x7ec   :  { %v1657_v53 = vpop.permute.xlu0 %1656  ;;  %v1652_v54 = vpop.permute.xlu1 %1651 }
 0x7ed   :  { %1586 = vmatpush3.bf16.xpose.msk.msra.mxu0 %vm2060_vm10, %v1584_v52  ;;  %1594 = vmatpush3.bf16.xpose.msk.msra.mxu1 %vm2060_vm10, %v1592_v51  ;;  %v1659_v57 = vunpack.i.h.bf16 %v1657_v53  ;;  %v1658_v58 = vunpack.i.l.bf16 %v1657_v53  ;;  %v1654_v59 = vunpack.i.h.bf16 %v1652_v54  ;;  %v1653_v61 = vunpack.i.l.bf16 %v1652_v54 }
 0x7ee   :  { %1587 = vmatprep.subr.bf16.mxu0 %v1822_v18  ;;  %1595 = vmatprep.subr.bf16.mxu1 %v1822_v18 }
 0x7ef   :  { %v1596_v3 = vpack.c.bf16 %v1659_v57, %v1658_v58  ;;  %v1588_v4 = vpack.c.bf16 %v1654_v59, %v1653_v61 }
 0x7f0   :  { %v785_v1 = vpop.permute.xlu0 %784  ;;  %v690_v2 = vpop.permute.xlu1 %689 }
 0x7f4   :  { %v2070_v5 = vpop.permute.xlu0 %878  ;;  %v2072_v6 = vpop.permute.xlu1 %876 }
 0x7f5   :  { %1590 = vmatpush3.bf16.xpose.msk.msra.mxu0 %vm2060_vm10, %v1588_v4  ;;  %1598 = vmatpush3.bf16.xpose.msk.msra.mxu1 %vm2060_vm10, %v1596_v3  ;;  %v1600_v7 = vpack.c.bf16 %v2070_v5, %v2072_v6 }
 0x7f6   :  { %1599 = vmatprep.subr.bf16.mxu0 %v1822_v18  ;;  %1605 = vmatprep.subr.bf16.mxu1 %v1822_v18 }
 0x7f8   :  { %v2082_v8 = vpop.permute.xlu0 %882  ;;  %v2084_v9 = vpop.permute.xlu1 %880 }
 0x7f9   :  { %v1603_v10 = vpack.c.bf16 %v2082_v8, %v2084_v9 }
 0x7fc   :  { %1529 = vmatmul.mubr.msk.f32.vlgmr.msra.gmra.mrb[12].mxu0 %vm703_vm9, %v690_v2  ;;  %1540 = vmatmul.mubr.msk.f32.vlgmr.msra.gmra.mrb[12].mxu1 %vm703_vm9, %v785_v1 }
 0x7fd   :  { %1601 = vmatpush3.bf16.msra.mxu0 %v1600_v7  ;;  %1607 = vmatpush3.bf16.msra.mxu1 %v1600_v7 }
 0x7fe   :  { %1602 = vmatprep.subr.bf16.mxu0 %v1822_v18  ;;  %1608 = vmatprep.subr.bf16.mxu1 %v1822_v18 }
 0x7ff   :  { %1550 = vmatprep.mubr.msk.f32.mxu0 %vm1818_vm0, %v1817_v0  ;;  %1561 = vmatprep.mubr.msk.f32.mxu1 %vm1818_vm0, %v1817_v0 }
 0x801   :  { %1604 = vmatpush3.bf16.msra.mxu0 %v1603_v10  ;;  %1610 = vmatpush3.bf16.msra.mxu1 %v1603_v10 }
 0x802   :  { %1611 = vmatprep.subr.bf16.mxu1 %v1822_v18 }
 0x84e   :  { %v2097_v11 = vpop.f32.mrb[8].mxu1 }
 0x84f   :  { %v2099_v12 = vpop.f32.mrb[9].mxu1 }
 0x850   :  { %v2101_v13 = vpop.f32.mrb[10].mxu1 }
 0x851   :  { %v2103_v14 = vpop.f32.mrb[11].mxu1 }
 0x8cf   :  { %v780_v16 = vpop.f32.mrb[12].mxu0  ;;  %v870_v17 = vpop.f32.mrb[12].mxu1 }
 0x8d0   :  { %v875_v19 = vmul.f32 %v2105_v15, %v780_v16  ;;  %v961_v20 = vmul.f32 %v2105_v15, %v870_v17  ;;  %v1530_v21 = vpop.f32.mrb[13].mxu0  ;;  %v1541_v22 = vpop.f32.mrb[13].mxu1 }
 0x8d2   :  { %1551 = vmatmul.mubr.msk.f32.vlgmr.msra.gmra.mrb[14].mxu0 %vm228_vm2, %v875_v19  ;;  %1562 = vmatmul.mubr.msk.f32.vlgmr.msra.gmra.mrb[14].mxu1 %vm228_vm2, %v961_v20 }
 0x8d3   :  { %1566 = vmatprep.mubr.msk.f32.mxu0 %vm386_vm4, %v2004_v48  ;;  %1580 = vmatprep.mubr.msk.f32.mxu1 %vm1818_vm0, %v1817_v0 }
 0x9a5   :  { %v957_v23 = vpop.f32.mrb[14].mxu0  ;;  %v1031_v24 = vpop.f32.mrb[14].mxu1 }
 0x9a6   :  { %1037 = vrot.lane.b32.xlu1 %v957_v23, %s1819_s18  ;;  %v1552_v25 = vpop.f32.mrb[15].mxu0  ;;  %1042 = vrot.lane.b32.xlu0 %v1031_v24, %s1819_s18  ;;  %v1563_v26 = vpop.f32.mrb[15].mxu1 }
 0xa18   :  { %v1038_v27 = vpop.permute.xlu1 %1037  ;;  %v1043_v29 = vpop.permute.xlu0 %1042 }
 0xa19   :  { %v1040_v30 = vsel %vm1035_vm11, -1e+09, %v1038_v27  ;;  %v1045_v31 = vsel %vm1035_vm11, -1e+09, %v1043_v29 }
 0xa1a   :  { %v1047_v32 = vsel %vm1046_vm12, %v1040_v30, -inf  ;;  %v1063_v48 = vsel %vm1046_vm12, %v1045_v31, -inf }
 0xa1b   :  { %1048 = vmax.xlane.f32.xlu1 %v1047_v32  ;;  %1064 = vmax.xlane.f32.xlu0 %v1063_v48 }
 0xaa8   :  { %v1049_v0 = vpop.xlane.xlu1 %1048  ;;  %v1065_v33 = vpop.xlane.xlu0 %1064 }
 0xaa9   :  { %v1050_v34 = vsub.f32 %v1040_v30, %v1049_v0  ;;  %v1066_v35 = vsub.f32 %v1045_v31, %v1065_v33  ;;  %v1372_v31 = vld [vmem:[#allocation7 + $0x4] ss:$0 sm:$0xff] }
 0xaaa   :  { %v677_v48 = vadd.f32 %v1372_v31, %v2103_v14  ;;  %v674_v0 = vadd.f32 %v1372_v31, %v2099_v12 }
 0xaab   :  { %v1051_v36 = vmul.f32 1.442695, %v1050_v34  ;;  %v1067_v38 = vmul.f32 1.442695, %v1066_v35 }
 0xaad   :  { %1684 = vpow2.f32 %v1051_v36 }
 0xaae   :  { %1686 = vpow2.f32 %v1067_v38 }
 0xab7   :  { %v1685_v39 = vpop.eup %1684 }
 0xab8   :  { %v1687_v40 = vpop.eup %1686  ;;  %1054 = vrot.lane.b32.xlu0 %v1685_v39, %s1820_s0 }
 0xab9   :  { %1070 = vrot.lane.b32.xlu1 %v1687_v40, %s1820_s0 }
 0xb2a   :  { %v1055_v41 = vpop.permute.xlu0 %1054 }
 0xb2b   :  { %v1071_v42 = vpop.permute.xlu1 %1070  ;;  %v1058_v43 = vsel %vm1057_vm13, %v1055_v41, 0.0 }
 0xb2c   :  { %v1073_v44 = vsel %vm1057_vm13, %v1071_v42, 0.0  ;;  %1059 = vadd.xlane.f32.xlu1 %v1058_v43  ;;  %v682_v42 = vadd.f32 %v2097_v11, %v1372_v31 }
 0xb2d   :  { %1074 = vadd.xlane.f32.xlu0 %v1073_v44 }
 0xbb9   :  { %v1060_v47 = vpop.xlane.xlu1 %1059 }
 0xbba   :  { %1688 = vrcp.f32 %v1060_v47  ;;  %v1075_v49 = vpop.xlane.xlu0 %1074 }
 0xbbb   :  { %1690 = vrcp.f32 %v1075_v49 }
 0xbc4   :  { %v1689_v50 = vpop.eup %1688 }
 0xbc5   :  { %v1691_v51 = vpop.eup %1690  ;;  %v1062_v52 = vmul.f32 %v1689_v50, %v1685_v39 }
 0xbc6   :  { %v1077_v53 = vmul.f32 %v1691_v51, %v1687_v40  ;;  %v685_v40 = vadd.f32 %v2101_v13, %v1372_v31 }
 0xbc7   :  { %vm1078_vm14 = vcmp.lt.f32.partialorder %v1062_v52, 0.075 }
 0xbc8   :  { %1085 = vrot.lane.b32.xlu1 %v1077_v53, %s1826_s13  ;;  %v1079_v54 = vsel %vm1078_vm14, 0.0, %v1062_v52 }
 0xbc9   :  { %1081 = vrot.lane.b32.xlu0 %v1079_v54, %s1820_s0 }
 0xbcc   :  { %1174 = vrot.lane.b32.xlu1 %v1993_v45, %s1827_s28 }
 0xbcd   :  { %1176 = vrot.lane.b32.xlu0 %v2012_v55, %s1827_s28 }
 0xbd0   :  { %1178 = vrot.lane.b32.xlu1 %v2000_v46, %s1827_s28 }
 0xbd1   :  { %1180 = vrot.lane.b32.xlu0 %v2019_v56, %s1827_s28 }
 0xc3a   :  { %v1086_v57 = vpop.permute.xlu1 %1085 }
 0xc3b   :  { %v1082_v58 = vpop.permute.xlu0 %1081 }
 0xc3c   :  { %v1088_v59 = vsel %vm1057_vm13, %v1082_v58, %v1086_v57 }
 0xc3d   :  { %1564 = vmatprep.subr.mxu0 %v1088_v59 }
 0xc3e   :  { %1565 = vmatpush3.msra.mxu0 %v1088_v59 }
 0xc3f   :  { %1567 = vmatmul.mubr.msk.f32.vlgmr.msra.gmra.mrb[16].mxu0 %vm386_vm4, %v2026_v62  ;;  %v1177_v3 = vpop.permute.xlu0 %1176 }
 0xc40   :  { %1569 = vmatprep.mubr.msk.f32.mxu0 %vm386_vm4, %v2024_v60  ;;  %v1175_v60 = vpop.permute.xlu1 %1174 }
 0xc43   :  { %1570 = vmatmul.mubr.msk.f32.gmra.mrb[18].mxu0 %vm386_vm4, %v2032_v63  ;;  %v1181_v10 = vpop.permute.xlu0 %1180 }
 0xc44   :  { %v1179_v4 = vpop.permute.xlu1 %1178 }
 0xd12   :  { %v1568_v45 = vpop.f32.mrb[16].mxu0 }
 0xd13   :  { %v1203_v46 = vmul.f32 %v1568_v45, %v2070_v5  ;;  %v1155_v55 = vpop.f32.mrb[17].mxu0  ;;  %v1187_v63 = vmul.f32 %v1568_v45, %v1177_v3 }
 0xd14   :  { %v1202_v56 = vmul.f32 %v1155_v55, %v2072_v6  ;;  %v1186_v6 = vmul.f32 %v1175_v60, %v1155_v55 }
 0xd15   :  { %1212 = vrot.lane.b32.xlu0 %v1203_v46, %s1828_s29  ;;  %v1193_v5 = vsel %vm1057_vm13, %v1187_v63, 0.0 }
 0xd16   :  { %1210 = vrot.lane.b32.xlu1 %v1202_v56, %s1828_s29  ;;  %v1571_v61 = vpop.f32.mrb[18].mxu0 }
 0xd17   :  { %v1205_v1 = vmul.f32 %v1571_v61, %v2082_v8  ;;  %v1165_v2 = vpop.f32.mrb[19].mxu0  ;;  %v1189_v17 = vmul.f32 %v1571_v61, %v1181_v10  ;;  %v1190_v8 = vsel %vm1057_vm13, %v1186_v6, 0.0 }
 0xd18   :  { %v1204_v62 = vmul.f32 %v1165_v2, %v2084_v9  ;;  %v1188_v7 = vmul.f32 %v1179_v4, %v1165_v2 }
 0xd19   :  { %1216 = vrot.lane.b32.xlu0 %v1205_v1, %s1828_s29  ;;  %v1199_v9 = vsel %vm1057_vm13, %v1189_v17, 0.0 }
 0xd1a   :  { %1214 = vrot.lane.b32.xlu1 %v1204_v62, %s1828_s29  ;;  %v1196_v16 = vsel %vm1057_vm13, %v1188_v7, 0.0 }
 0xd38   :  { %1194 = vadd.xlane.f32.xlu0 %v1193_v5 }
 0xd3c   :  { %1197 = vadd.xlane.f32.xlu0 %v1196_v16 }
 0xd3e   :  { %1191 = vadd.xlane.f32.xlu1 %v1190_v8 }
 0xd42   :  { %1200 = vadd.xlane.f32.xlu1 %v1199_v9 }
 0xd87   :  { %v1213_v19 = vpop.permute.xlu0 %1212 }
 0xd88   :  { %v1211_v20 = vpop.permute.xlu1 %1210  ;;  %v1225_v21 = vsel %vm1057_vm13, %v1213_v19, 0.0 }
 0xd89   :  { %1226 = vadd.xlane.f32.xlu1 %v1225_v21  ;;  %v1222_v22 = vsel %vm1057_vm13, %v1211_v20, 0.0 }
 0xd8a   :  { %1223 = vadd.xlane.f32.xlu0 %v1222_v22 }
 0xd8b   :  { %v1217_v23 = vpop.permute.xlu0 %1216 }
 0xd8c   :  { %v1215_v24 = vpop.permute.xlu1 %1214  ;;  %v1231_v25 = vsel %vm1057_vm13, %v1217_v23, 0.0 }
 0xd8d   :  { %1232 = vadd.xlane.f32.xlu1 %v1231_v25  ;;  %v1228_v26 = vsel %vm1057_vm13, %v1215_v24, 0.0 }
 0xd8e   :  { %1229 = vadd.xlane.f32.xlu0 %v1228_v26 }
 0xdc5   :  { %v1195_v29 = vpop.xlane.xlu0 %1194 }
 0xdc6   :  { %v1235_v34 = vmul.f32 %v1195_v29, %v677_v48 }
 0xdc9   :  { %v1198_v32 = vpop.xlane.xlu0 %1197 }
 0xdca   :  { %v1236_v12 = vmul.f32 %v1198_v32, %v682_v42 }
 0xdcb   :  { %v1192_v27 = vpop.xlane.xlu1 %1191 }
 0xdcc   :  { %v1234_v38 = vmul.f32 %v1192_v27, %v674_v0 }
 0xdcf   :  { %v1201_v30 = vpop.xlane.xlu1 %1200 }
 0xdd0   :  { %v1237_v47 = vmul.f32 %v1201_v30, %v685_v40 }
 0xe16   :  { %v1227_v33 = vpop.xlane.xlu1 %1226 }
 0xe17   :  { %v1239_v35 = vmul.f32 %v1227_v33, %v677_v48  ;;  %v1224_v36 = vpop.xlane.xlu0 %1223 }
 0xe18   :  { %v1238_v39 = vmul.f32 %v1224_v36, %v674_v0 }
 0xe19   :  { %v1243_v41 = vsel %vm386_vm4, %v1235_v34, %v1239_v35 }
 0xe1a   :  { %v1242_v43 = vsel %vm386_vm4, %v1234_v38, %v1238_v39  ;;  %v1233_v44 = vpop.xlane.xlu1 %1232 }
 0xe1b   :  { %v1612_v49 = vpack.c.bf16 %v1243_v41, %v1242_v43  ;;  %v1241_v14 = vmul.f32 %v1233_v44, %v685_v40  ;;  %v1230_v50 = vpop.xlane.xlu0 %1229 }
 0xe1c   :  { %v1240_v51 = vmul.f32 %v1230_v50, %v682_v42 }
 0xe1d   :  { %v1245_v52 = vsel %vm386_vm4, %v1237_v47, %v1241_v14  ;;  %1613 = vmatpush3.bf16.msra.mxu1 %v1612_v49 }
 0xe1e   :  { %v1244_v53 = vsel %vm386_vm4, %v1236_v12, %v1240_v51  ;;  %1614 = vmatprep.subr.bf16.mxu1 %v1822_v18 }
 0xe1f   :  { %v1615_v13 = vpack.c.bf16 %v1245_v52, %v1244_v53 }
 0xe21   :  { %1616 = vmatpush3.bf16.msra.mxu1 %v1615_v13 }
 0xe24   :  { %1581 = vmatmul.mubr.msk.f32.vlgmr.msra.gmra.mrb[16].mxu1 %vm228_vm2, %v2105_v15 }
 0xef7   :  { %v1315_v11 = vpop.f32.mrb[16].mxu1 }
 0xef8   :  { %1321 = vrot.lane.b32.xlu0 %v1315_v11, %s1821_s19  ;;  %v1582_v54 = vpop.f32.mrb[17].mxu1  ;;  %v1319_v18 = vadd.f32 %v1315_v11, %v1983_v37 }
 0xf6a   :  { %v1322_v57 = vpop.permute.xlu0 %1321 }
 0xf6b   :  { %v1324_v58 = vadd.f32 %v1322_v57, %v1983_v37 }
 0xf6d   :  { %1326 = vrot.lane.b32.xlu1 %v1324_v58, %s1829_s30 }
 0xf71   :  { %1329 = vrot.lane.b32.xlu1 %v1970_v28, %s1830_s9 }
 0xfdf   :  { %v1327_v59 = vpop.permute.xlu1 %1326 }
 0xfe0   :  { %v1332_v45 = vsel %vm386_vm4, %v1319_v18, %v1327_v59 }
 0xfe3   :  { %v1330_v46 = vpop.permute.xlu1 %1329 }
 0xfe4   :  { %v1333_v15 = vsel %vm703_vm9, %v1332_v45, %v1330_v46 }
 0xfe5   :  { %v1335_v55 = vsel %vm1334_vm15, %v1333_v15, 0.0 }
 0xfe6   :  { %1336 = vst [vmem:[%s2173_s7] sm:$0xff] %v1335_v55 }
 0xfe7   :  { %1341 = vsyncpa [#allocation3], 1 }
 0xfe8   :  { %1342 = vsyncpa [#allocation5], 1 }
 0xfe9   :  { %1343 = vsyncpa [#allocation8], 1 }

</bundles_post_ra>
